<compile_context>
chip_gen: v6e
topology: v6e:2x2x1
jax: 0.10.0
libtpu: 0.0.40
codegen_flags: <defaults>
</compile_context>

<pallas_src>
import math

import jax
import jax.numpy as jnp
from jax.experimental import pallas as pl
from jax.experimental.pallas import tpu as pltpu


def highway_kernel(x_ref, w_ref, b_ref, o_ref):
    # x_ref: (tm, Dp)   w_ref: (Dp, 2*Dp)   b_ref: (1, 2*Dp)   o_ref: (tm, Dp)
    x = x_ref[...]
    w = w_ref[...]
    dp = x_ref.shape[1]

    # One fused MXU call for both projections; f32 accumulation.
    ht = jnp.dot(x.astype(w.dtype), w, preferred_element_type=jnp.float32)
    ht = ht + b_ref[...]

    h = jnp.maximum(ht[:, :dp], 0.0)      # ReLU(H)       (VPU)
    t = jax.nn.sigmoid(ht[:, dp:])        # sigmoid(T)    (EUP path)

    xf = x.astype(jnp.float32)
    # y = H*T + x*(1-T)  ==  x + T*(H - x)
    o_ref[...] = (xf + t * (h - xf)).astype(o_ref.dtype)


def _round_down(n, m):
    return max(m, (n // m) * m)


def _pack_factor(d, target_lanes=128):
    """Smallest k with (k*d) % target_lanes == 0; 1 if packing isn't worth it."""
    if d % target_lanes == 0:
        return 1
    k = target_lanes // math.gcd(d, target_lanes)
    return k if k <= 16 else 1   # avoid huge block-diagonal blow-up for odd D


def _choose_tm(rows, dp, in_bytes, resident_bytes):
    f32 = 4
    # Per-row VMEM bytes: double-buffered x tile + double-buffered out tile
    # + f32 temporaries (ht is 2*Dp wide; h/t/y another ~3*Dp).
    per_row = dp * (2 * in_bytes + 2 * in_bytes + 2 * f32 + 3 * f32)
    vmem_budget = max(per_row, 24 * 1024 * 1024 - resident_bytes)  # v7x-safe
    tm_vmem = _round_down(vmem_budget // per_row, 8)
    tm_bw = _round_down((2 * 1024 * 1024) // (dp * in_bytes), 8)   # ~2 MiB tile
    tm = min(tm_bw, tm_vmem, 16384)
    if rows <= tm:
        if rows >= 16:
            # Keep at least 2 grid steps so both v7x TensorCores get work.
            half = (rows + 1) // 2
            tm = ((half + 7) // 8) * 8
        else:
            tm = rows              # block == full array dim (allowed)
    return tm


def highway(x, wh_t, bh, wt_t, bt, *, matmul_dtype=jnp.bfloat16, lane_pack=128):
    """Tacotron Highway.  x: (..., D); wh_t/wt_t: (D, D) (y = x @ w_t); bh/bt: (D,)."""
    orig_shape = x.shape
    d = orig_shape[-1]
    assert wh_t.shape == (d, d) and wt_t.shape == (d, d)
    assert bh.shape == (d,) and bt.shape == (d,)

    x2d = x.reshape(-1, d)
    n = x2d.shape[0]

    # ---- wrapper-side lane packing: (N, D) -> (N/k, k*D), block-diag weights.
    k = _pack_factor(d, lane_pack)
    pad = (-n) % k
    if pad:
        x2d = jnp.concatenate([x2d, jnp.zeros((pad, d), x2d.dtype)], axis=0)
    rows = (n + pad) // k
    dp = k * d
    x_packed = x2d.reshape(rows, dp)          # contiguous row merge: free

    eye = jnp.eye(k, dtype=jnp.float32)
    w_pack = jnp.concatenate(                 # (Dp, 2*Dp) = [H lanes | T lanes]
        [jnp.kron(eye, wh_t.astype(jnp.float32)),
         jnp.kron(eye, wt_t.astype(jnp.float32))], axis=1,
    ).astype(matmul_dtype)
    b_pack = jnp.concatenate([jnp.tile(bh, k), jnp.tile(bt, k)]
                             ).astype(jnp.float32).reshape(1, 2 * dp)

    in_bytes = jnp.dtype(x.dtype).itemsize
    w_bytes = dp * 2 * dp * jnp.dtype(matmul_dtype).itemsize + 2 * dp * 4
    tm = _choose_tm(rows, dp, in_bytes, w_bytes)
    grid = pl.cdiv(rows, tm)

    cost = pl.CostEstimate(
        flops=4 * rows * dp * dp + 6 * rows * dp,
        transcendentals=rows * dp,
        bytes_accessed=2 * rows * dp * in_bytes + w_bytes,
    )

    out = pl.pallas_call(
        highway_kernel,
        out_shape=jax.ShapeDtypeStruct((rows, dp), x.dtype),
        grid=(grid,),
        in_specs=[
            pl.BlockSpec((tm, dp), lambda i: (i, 0)),        # x row tile
            pl.BlockSpec((dp, 2 * dp), lambda i: (0, 0)),    # fused weights (VMEM-resident)
            pl.BlockSpec((1, 2 * dp), lambda i: (0, 0)),     # fused bias (VMEM-resident)
        ],
        out_specs=pl.BlockSpec((tm, dp), lambda i: (i, 0)),
        compiler_params=pltpu.CompilerParams(
            dimension_semantics=("parallel",),
        ),
        cost_estimate=cost,
    )(x_packed, w_pack, b_pack)

    out = out.reshape(rows * k, d)
    if pad:
        out = out[:n]
    return out.reshape(orig_shape)


def highway_ref(x, wh_t, bh, wt_t, bt):
    h = jax.nn.relu(x @ wh_t + bh)
    t = jax.nn.sigmoid(x @ wt_t + bt)
    return h * t + x * (1.0 - t)


if __name__ == "__main__":
    # Small shapes consistent with the module: Highway(in_size=32, out_size=32)
    # applied to (batch=2, seq=8, hidden=32).
    in_size = out_size = 32
    batch, seq = 2, 8

    key = jax.random.PRNGKey(0)
    kx, kwh, kwt = jax.random.split(key, 3)

    x = jax.random.normal(kx, (batch, seq, in_size), dtype=jnp.float32)

    # Emulate nn.Linear default init (weight shape (out, in)); biases per module.
    bound = 1.0 / math.sqrt(in_size)
    wh = jax.random.uniform(kwh, (out_size, in_size), jnp.float32, -bound, bound)
    wt = jax.random.uniform(kwt, (out_size, in_size), jnp.float32, -bound, bound)
    bh = jnp.zeros((out_size,), jnp.float32)            # H.bias.data.zero_()
    bt = jnp.full((out_size,), -1.0, jnp.float32)       # T.bias.data.fill_(-1)

    wh_t, wt_t = wh.T, wt.T
    ref = highway_ref(x, wh_t, bh, wt_t, bt)

    # f32-matmul path: tight check against the reference.
    out_f32 = jax.block_until_ready(
        highway(x, wh_t, bh, wt_t, bt, matmul_dtype=jnp.float32))
    assert out_f32.shape == x.shape
    assert jnp.allclose(out_f32, ref, atol=1e-5, rtol=1e-5), "f32 mismatch vs reference"

    # bf16-matmul path (default per perf review): f32 accumulation, looser tol.
    out_bf16 = jax.block_until_ready(highway(x, wh_t, bh, wt_t, bt))
    assert out_bf16.shape == x.shape
    assert jnp.allclose(out_bf16, ref, atol=2e-2, rtol=2e-2), "bf16 mismatch vs reference"

    print("KERNEL_OK")
</pallas_src>

<mosaic_0001>
module attributes {stable_mosaic.version = 11 : i64} {
  func.func @highway_kernel(%arg0: i32, %arg1: memref<4x128xf32, #tpu.memory_space<vmem>>, %arg2: memref<128x256xf32, #tpu.memory_space<vmem>>, %arg3: memref<1x256xf32, #tpu.memory_space<vmem>>, %arg4: memref<4x128xf32, #tpu.memory_space<vmem>>) attributes {dimension_semantics = [#tpu.dimension_semantics<parallel>], iteration_bounds = array<i64: 1>, scalar_prefetch = 0 : i64, scratch_operands = 0 : i64, tpu.core_type = #tpu.core_type<tc>, window_params = [{transform_indices = @transform_0, window_bounds = array<i64: 4, 128>}, {pipeline_mode = #tpu.pipeline_mode<synchronous>, transform_indices = @transform_1, window_bounds = array<i64: 128, 256>}, {pipeline_mode = #tpu.pipeline_mode<synchronous>, transform_indices = @transform_2, window_bounds = array<i64: 1, 256>}, {transform_indices = @transform_3, window_bounds = array<i64: 4, 128>}]} {
    %c0 = arith.constant 0 : index
    %c0_0 = arith.constant 0 : index
    %0 = vector.load %arg1[%c0, %c0_0] : memref<4x128xf32, #tpu.memory_space<vmem>>, vector<4x128xf32>
    %c0_1 = arith.constant 0 : index
    %c0_2 = arith.constant 0 : index
    %1 = vector.load %arg2[%c0_1, %c0_2] : memref<128x256xf32, #tpu.memory_space<vmem>>, vector<128x256xf32>
    %cst = arith.constant dense<0.000000e+00> : vector<4x256xf32>
    %2 = tpu.matmul %0, %1, %cst {dimension_numbers = #tpu.dot_dimension_numbers<[1], [0], [0], [1], [0, 0, 1, 1], [], []>} : vector<4x128xf32>, vector<128x256xf32>, vector<4x256xf32> -> vector<4x256xf32>
    %c0_3 = arith.constant 0 : index
    %c0_4 = arith.constant 0 : index
    %3 = vector.load %arg3[%c0_3, %c0_4] : memref<1x256xf32, #tpu.memory_space<vmem>>, vector<1x256xf32>
    %4 = vector.broadcast %3 : vector<1x256xf32> to vector<4x256xf32>
    %5 = arith.addf %2, %4 : vector<4x256xf32>
    %6 = vector.extract_strided_slice %5 {offsets = [0, 0], sizes = [4, 128], strides = [1, 1]} : vector<4x256xf32> to vector<4x128xf32>
    %cst_5 = arith.constant 0.000000e+00 : f32
    %7 = vector.broadcast %cst_5 : f32 to vector<4x128xf32>
    %8 = arith.maximumf %6, %7 : vector<4x128xf32>
    %9 = vector.extract_strided_slice %5 {offsets = [0, 128], sizes = [4, 128], strides = [1, 1]} : vector<4x256xf32> to vector<4x128xf32>
    %10 = arith.negf %9 : vector<4x128xf32>
    %11 = math.exp %10 : vector<4x128xf32>
    %cst_6 = arith.constant 1.000000e+00 : f32
    %12 = vector.broadcast %cst_6 : f32 to vector<4x128xf32>
    %13 = arith.addf %12, %11 : vector<4x128xf32>
    %14 = arith.divf %12, %13 : vector<4x128xf32>
    %15 = arith.subf %8, %0 : vector<4x128xf32>
    %16 = arith.mulf %14, %15 : vector<4x128xf32>
    %17 = arith.addf %0, %16 : vector<4x128xf32>
    %c0_7 = arith.constant 0 : index
    %c0_8 = arith.constant 0 : index
    %18 = vector.load %arg4[%c0_7, %c0_8] : memref<4x128xf32, #tpu.memory_space<vmem>>, vector<4x128xf32>
    tpu.vector_store %arg4[%c0_7, %c0_8], %17 {strides = array<i32>} : memref<4x128xf32, #tpu.memory_space<vmem>>, vector<4x128xf32>,
    return
  }
  func.func @transform_0(%arg0: i32) -> (i32, i32) {
    %c0_i32 = arith.constant 0 : i32
    %c0_i32_0 = arith.constant 0 : i32
    return %arg0, %c0_i32 : i32, i32
  }
  func.func @transform_1(%arg0: i32) -> (i32, i32) {
    %c0_i32 = arith.constant 0 : i32
    %c0_i32_0 = arith.constant 0 : i32
    %c0_i32_1 = arith.constant 0 : i32
    return %c0_i32, %c0_i32_0 : i32, i32
  }
  func.func @transform_2(%arg0: i32) -> (i32, i32) {
    %c0_i32 = arith.constant 0 : i32
    %c0_i32_0 = arith.constant 0 : i32
    %c0_i32_1 = arith.constant 0 : i32
    return %c0_i32, %c0_i32_0 : i32, i32
  }
  func.func @transform_3(%arg0: i32) -> (i32, i32) {
    %c0_i32 = arith.constant 0 : i32
    %c0_i32_0 = arith.constant 0 : i32
    return %arg0, %c0_i32 : i32, i32
  }
}

</mosaic_0001>

<bundles_post_ra>
// kernel: tpu_custom_call.1
= control target key start
LH: loop header
LB: loop body
LE: loop exit
PB: predicated region body
PF: predicated region fallthrough
CT: control target
= control target key end

     0   :  { %8 = vsyncpa [#allocation3], 0  ;;  %s299_s0 = inlined_call_operand.hbm [shape: f32[4,128], index: 0, kind: input, shape index: {}]   ;;  %s300_s1 = inlined_call_operand.hbm [shape: f32[128,256], index: 1, kind: input, shape index: {}]   ;;  %s301_s2 = inlined_call_operand.vmem [shape: f32[1,256], index: 2, kind: input, shape index: {}]   ;;  %s302_s3 = inlined_call_operand.hbm [shape: f32[4,128], index: 3, kind: output, shape index: {}]  }
   0x1   :  { %9 = vsyncpa [#allocation6], 0 }
   0x2   :  { %10 = vsyncpa [#allocation4], 0  ;;  %s261_s12 = smov [#allocation2]   ;;  %s262_s14 = smov [#allocation5]  }
   0x3   :  { %s17_s13 = sshll.u32 %s261_s12, 4  ;;  %s26_s15 = sshll.u32 %s262_s14, 4  ;;  %s18_s13 = int_to_ptr.vmem [resolvable:$true] %s17_s13  ;;  %s27_s15 = int_to_ptr.vmem [resolvable:$true] %s26_s15 }
   0x4   :  { %s203_s16 = scalar_lea.vmem %s18_s13, 64  ;;  %p208_p1 = scmp.lt.s32.totalorder %s18_s13, %s18_s13 }
   0x5   :  { %p204_p0 = scmp.ne.s32.totalorder %s18_s13, %s203_s16  ;;  %p209_p2 = scmp.lt.s32.totalorder %s203_s16, %s203_s16 }
   0x7   :  { %p210_p3 = por %p209_p2, %p208_p1 }
   0x9   :  { %p211_p4 = pnand %p210_p3, %p204_p0 }
   0xb   :  { %214 = shalt.err (!%p211_p4)
}
   0xc   :  { %20 = dma.hbm_to_vmem [thread:$0]  %s299_s0, 64, %s18_s13, [#allocation3]  }
   0xd   :  { %s223_s19 = scalar_lea.vmem %s27_s15, 4096  ;;  %p228_p6 = scmp.lt.s32.totalorder %s27_s15, %s27_s15 }
   0xe   :  { %p224_p5 = scmp.ne.s32.totalorder %s27_s15, %s223_s19  ;;  %p229_p7 = scmp.lt.s32.totalorder %s223_s19, %s223_s19 }
  0x10   :  { %p230_p8 = por %p229_p7, %p228_p6 }
  0x12   :  { %p231_p9 = pnand %p230_p8, %p224_p5 }
  0x14   :  { %234 = shalt.err (!%p231_p9)
}
  0x15   :  { %s263_s20 = smov 256   ;;  %s264_s21 = smov 16  }
  0x16   :  { %32 = dma.hbm_to_vmem [thread:$0]  %s300_s1, 4096, %s27_s15, [#allocation6], %s263_s20, %s263_s20, %s264_s21  }
  0x17   :  { %255 = dma.done.wait [#allocation3], 64  }
  0x18   :  { %256 = vsyncadd [#allocation3], 4294967232 }
  0x19   :  { %257 = dma.done.wait [#allocation6], 4096  }
  0x1a   :  { %258 = vsyncadd [#allocation6], 4294963200  ;;  %v265_v0 = vmov 0.0   ;;  %v73_v1 = vld [vmem:[#allocation5 + $0xf8] sm:$0xff]  ;;  %v72_v2 = vld [vmem:[#allocation5 + $0xf0] sm:$0xff]  ;;  %v76_v34 = vlaneseq  ;;  %s266_s24 = smov [#allocation7]  }
  0x1b   :  { %150 = vmatprep.mubr.f32.mxu0 %v265_v0  ;;  %v71_v3 = vld [vmem:[#allocation5 + $0xe8] sm:$0xff]  ;;  %86 = vmatprep.subr.mxu0 %v73_v1  ;;  %v70_v4 = vld [vmem:[#allocation5 + $0xe0] sm:$0xff]  ;;  %v69_v5 = vld [vmem:[#allocation5 + $0xd8] sm:$0xff]  ;;  %s174_s25 = sshll.u32 %s266_s24, 4  ;;  %s175_s25 = int_to_ptr.vmem [resolvable:$true] %s174_s25 }
  0x1c   :  { %87 = vmatpush1.msra.mxu0 %v72_v2  ;;  %v68_v6 = vld [vmem:[#allocation5 + $0xd0] sm:$0xff]  ;;  %v67_v7 = vld [vmem:[#allocation5 + $0xc8] sm:$0xff]  ;;  %v66_v8 = vld [vmem:[#allocation5 + $0xc0] sm:$0xff]  ;;  %v77_v35 = vshrl.u32 %v76_v34, 7  ;;  %p240_p11 = scmp.lt.s32.totalorder %s175_s25, %s175_s25 }
  0x1d   :  { %88 = vmatprep.subr.mxu0 %v71_v3  ;;  %v65_v9 = vld [vmem:[#allocation5 + $0xb8] sm:$0xff]  ;;  %v64_v10 = vld [vmem:[#allocation5 + $0xb0] sm:$0xff]  ;;  %v63_v11 = vld [vmem:[#allocation5 + $0xa8] sm:$0xff] }
  0x1e   :  { %89 = vmatpush1.msra.mxu0 %v70_v4  ;;  %v62_v12 = vld [vmem:[#allocation5 + $0xa0] sm:$0xff]  ;;  %v61_v13 = vld [vmem:[#allocation5 + $0x98] sm:$0xff]  ;;  %v60_v14 = vld [vmem:[#allocation5 + $0x90] sm:$0xff]  ;;  %v82_v36 = vsub.s32 1, %v77_v35  ;;  %v78_v43 = vsub.s32 0, %v77_v35 }
  0x1f   :  { %90 = vmatprep.subr.mxu0 %v69_v5  ;;  %v59_v15 = vld [vmem:[#allocation5 + $0x88] sm:$0xff]  ;;  %v58_v16 = vld [vmem:[#allocation5 + $0x80] sm:$0xff]  ;;  %v57_v17 = vld [vmem:[#allocation5 + $0x78] sm:$0xff] }
  0x20   :  { %91 = vmatpush1.msra.mxu0 %v68_v6  ;;  %v56_v18 = vld [vmem:[#allocation5 + $0x70] sm:$0xff]  ;;  %v55_v19 = vld [vmem:[#allocation5 + $0x68] sm:$0xff]  ;;  %v54_v20 = vld [vmem:[#allocation5 + $0x60] sm:$0xff] }
  0x21   :  { %92 = vmatprep.subr.mxu0 %v67_v7  ;;  %v53_v21 = vld [vmem:[#allocation5 + $0x58] sm:$0xff]  ;;  %v52_v22 = vld [vmem:[#allocation5 + $0x50] sm:$0xff]  ;;  %v51_v23 = vld [vmem:[#allocation5 + $0x48] sm:$0xff] }
  0x22   :  { %93 = vmatpush1.msra.mxu0 %v66_v8  ;;  %v50_v24 = vld [vmem:[#allocation5 + $0x40] sm:$0xff]  ;;  %v49_v25 = vld [vmem:[#allocation5 + $0x38] sm:$0xff]  ;;  %v48_v26 = vld [vmem:[#allocation5 + $0x30] sm:$0xff] }
  0x23   :  { %94 = vmatprep.subr.mxu0 %v65_v9  ;;  %v47_v27 = vld [vmem:[#allocation5 + $0x28] sm:$0xff]  ;;  %v46_v28 = vld [vmem:[#allocation5 + $0x20] sm:$0xff]  ;;  %v45_v29 = vld [vmem:[#allocation5 + $0x18] sm:$0xff] }
  0x24   :  { %95 = vmatpush1.msra.mxu0 %v64_v10  ;;  %v44_v30 = vld [vmem:[#allocation5 + $0x10] sm:$0xff]  ;;  %v43_v31 = vld [vmem:[#allocation5 + $0x8] sm:$0xff]  ;;  %v42_v32 = vld [vmem:[#allocation5] sm:$0xff] }
  0x25   :  { %96 = vmatprep.subr.mxu0 %v63_v11  ;;  %v41_v33 = vld [vmem:[#allocation2] sm:$0xf] }
  0x26   :  { %97 = vmatpush1.msra.mxu0 %v62_v12  ;;  %v74_v37 = vld [vmem:[%s301_s2] sm:$0x3]  ;;  %s235_s2 = scalar_lea.vmem %s175_s25, 64 }
  0x27   :  { %98 = vmatprep.subr.mxu0 %v61_v13  ;;  %v83_v38 = vrot.slane %v74_v37, %v82_v36  ;;  %v79_v46 = vrot.slane %v74_v37, %v78_v43  ;;  %p236_p10 = scmp.ne.s32.totalorder %s175_s25, %s235_s2  ;;  %p241_p12 = scmp.lt.s32.totalorder %s235_s2, %s235_s2 }
  0x28   :  { %99 = vmatpush1.msra.mxu0 %v60_v14 }
  0x29   :  { %100 = vmatprep.subr.mxu0 %v59_v15  ;;  %p242_p13 = por %p241_p12, %p240_p11 }
  0x2a   :  { %101 = vmatpush1.msra.mxu0 %v58_v16 }
  0x2b   :  { %102 = vmatprep.subr.mxu0 %v57_v17  ;;  %p243_p0 = pnand %p242_p13, %p236_p10 }
  0x2c   :  { %103 = vmatpush1.msra.mxu0 %v56_v18 }
  0x2d   :  { %104 = vmatprep.subr.mxu0 %v55_v19 }
  0x2e   :  { %105 = vmatpush1.msra.mxu0 %v54_v20 }
  0x2f   :  { %106 = vmatprep.subr.mxu0 %v53_v21 }
  0x30   :  { %107 = vmatpush1.msra.mxu0 %v52_v22 }
  0x31   :  { %108 = vmatprep.subr.mxu0 %v51_v23 }
  0x32   :  { %109 = vmatpush1.msra.mxu0 %v50_v24 }
  0x33   :  { %110 = vmatprep.subr.mxu0 %v49_v25 }
  0x34   :  { %111 = vmatpush1.msra.mxu0 %v48_v26 }
  0x35   :  { %112 = vmatprep.subr.mxu0 %v47_v27 }
  0x36   :  { %113 = vmatpush1.msra.mxu0 %v46_v28 }
  0x37   :  { %114 = vmatprep.subr.mxu0 %v45_v29 }
  0x38   :  { %115 = vmatpush1.msra.mxu0 %v44_v30 }
  0x39   :  { %116 = vmatprep.subr.mxu0 %v43_v31 }
  0x3a   :  { %117 = vmatpush1.msra.mxu0 %v42_v32 }
  0x3b   :  { %151 = vmatmul.mubr.f32.vlgmr.msra.gmra.mxu0 %v41_v33 }
  0xfb   :  { %v152_v39 = vpop.f32.mrf.mxu0 }
  0xfc   :  { %v153_v47 = vadd.f32 %v152_v39, %v79_v46 }
  0xfd   :  { %v154_v40 = vpop.f32.mrf.mxu0 }
  0xfe   :  { %v155_v41 = vadd.f32 %v154_v40, %v83_v38  ;;  %v157_v48 = vmax.f32 %v153_v47, 0.0 }
 0x100   :  { %v184_v42 = vmul.f32 -1.442695, %v155_v41  ;;  %v164_v49 = vsub.f32 %v157_v48, %v41_v33 }
 0x102   :  { %191 = vpow2.f32 %v184_v42 }
 0x10f   :  { %v192_v44 = vpop.eup %191 }
 0x110   :  { %v161_v45 = vadd.f32 1.0, %v192_v44 }
 0x112   :  { %193 = vrcp.f32 %v161_v45 }
 0x11f   :  { %v194_v50 = vpop.eup %193 }
 0x120   :  { %v165_v51 = vmul.f32 %v194_v50, %v164_v49 }
 0x122   :  { %v166_v52 = vadd.f32 %v165_v51, %v41_v33 }
 0x124   :  { %167 = vst [vmem:[#allocation7] sm:$0xf] %v166_v52 }
 0x125   :  { %246 = shalt.err (!%p243_p0)
}
 0x126   :  { %177 = dma.vmem_to_hbm [thread:$0]  %s175_s25, 64, %s302_s3, [#allocation4]  }
 0x127   :  { %259 = dma.done.wait [#allocation4], 64  }
 0x128   :  { %260 = vsyncadd [#allocation4], 4294967232 }
 0x129   :  { %181 = vsyncpa [#allocation3], 1 }
 0x12a   :  { %182 = vsyncpa [#allocation6], 1 }
 0x12b   :  { %183 = vsyncpa [#allocation4], 1 }

</bundles_post_ra>
